<compile_context>
chip_gen: v7x
topology: tpu7x:2x2x1
jax: 0.10.0
libtpu: 0.0.40
codegen_flags: <defaults>
</compile_context>

<pallas_src>
import functools

import jax
import jax.numpy as jnp
from jax.experimental import pallas as pl
from jax.experimental.pallas import tpu as pltpu

_LANES = 128
_SUBLANES = 8
_TILE_ELEMS = _SUBLANES * _LANES  # 1024


def _fsq_kernel(x_ref, o_ref, *, center: bool):
    x = x_ref[...]
    one = jnp.ones_like(x)
    low = -one if center else jnp.zeros_like(x)
    # round(sigmoid(x)) == 1 iff x > 0 (sigmoid(0)=0.5 rounds-to-even to 0,
    # matching the strict compare). Pure VPU; no EUP sigmoid, no round.
    q = jnp.where(x > 0, one, low)
    # Preserve torch semantics for NaN inputs: round(sigmoid(NaN)) == NaN.
    q = jnp.where(jnp.isnan(x), x, q)
    o_ref[...] = q.astype(o_ref.dtype)


def finite_scalar_quantizer(x, center: bool = False, *, block_rows: int = 8192):
    """Forward of FiniteScalarQuantizer. Accepts any shape/rank (float dtypes)."""
    orig_shape = x.shape
    orig_dtype = x.dtype
    n = x.size

    # Flatten to a lane-dense [rows, 128] view. Only pad for ragged sizes so
    # the common aligned case (typical NCHW activations) costs zero extra
    # HBM passes.
    n_pad = ((n + _TILE_ELEMS - 1) // _TILE_ELEMS) * _TILE_ELEMS
    padded = n_pad != n
    if padded:
        x_flat = jnp.pad(x.reshape(-1), (0, n_pad - n))
    else:
        x_flat = x.reshape(-1)
    rows = n_pad // _LANES  # multiple of 8 by construction
    x2d = x_flat.reshape(rows, _LANES)

    # Block size: multiple of 8 rows, default 8192 rows (4 MiB f32 / 2 MiB
    # bf16 per block); with double-buffered in+out that is <= 16 MiB VMEM.
    tr = min(block_rows, rows)
    tr = max(_SUBLANES, (tr // _SUBLANES) * _SUBLANES)
    if rows > _SUBLANES and rows <= tr:
        # Keep at least 2 grid steps so v7x's two TensorCores both get work.
        half = (rows + 1) // 2
        tr = ((half + _SUBLANES - 1) // _SUBLANES) * _SUBLANES
    grid = (pl.cdiv(rows, tr),)  # edge blocks handled/masked by Pallas

    out2d = pl.pallas_call(
        functools.partial(_fsq_kernel, center=center),
        out_shape=jax.ShapeDtypeStruct((rows, _LANES), orig_dtype),
        grid_spec=pltpu.PrefetchScalarGridSpec(
            num_scalar_prefetch=0,
            grid=grid,
            in_specs=[pl.BlockSpec((tr, _LANES), lambda i: (i, 0))],
            out_specs=pl.BlockSpec((tr, _LANES), lambda i: (i, 0)),
        ),
        compiler_params=pltpu.CompilerParams(
            dimension_semantics=("parallel",),
            vmem_limit_bytes=48 * 1024 * 1024,
        ),
    )(x2d)

    if padded:
        return out2d.reshape(-1)[:n].reshape(orig_shape)
    return out2d.reshape(orig_shape)


if __name__ == "__main__":
    key = jax.random.PRNGKey(0)

    # Aligned case: typical NCHW activation, batch=2, C=4, H=W=16 (2048 elems).
    x = jax.random.normal(key, (2, 4, 16, 16), dtype=jnp.float32) * 3.0
    ref = jnp.round(jax.nn.sigmoid(x))

    y = jax.block_until_ready(finite_scalar_quantizer(x, center=False))
    assert y.shape == x.shape and y.dtype == x.dtype
    assert jnp.allclose(y, ref), "mismatch (center=False)"

    y_c = jax.block_until_ready(finite_scalar_quantizer(x, center=True))
    assert jnp.allclose(y_c, 2.0 * ref - 1.0), "mismatch (center=True)"

    # Ragged case: exercises the pad path and the non-dividing (cdiv) grid.
    key2 = jax.random.PRNGKey(1)
    xr = jax.random.normal(key2, (2, 4, 16, 20), dtype=jnp.float32) * 3.0
    ref_r = jnp.round(jax.nn.sigmoid(xr))
    yr = jax.block_until_ready(finite_scalar_quantizer(xr, center=False))
    assert yr.shape == xr.shape and jnp.allclose(yr, ref_r), "mismatch (ragged)"

    print("KERNEL_OK")
</pallas_src>

<mosaic_0001>
module attributes {stable_mosaic.version = 11 : i64} {
  func.func @_fsq_kernel(%arg0: i32, %arg1: memref<8x128xf32, #tpu.memory_space<vmem>>, %arg2: memref<8x128xf32, #tpu.memory_space<vmem>>) attributes {dimension_semantics = [#tpu.dimension_semantics<parallel>], iteration_bounds = array<i64: 2>, scalar_prefetch = 0 : i64, scratch_operands = 0 : i64, tpu.core_type = #tpu.core_type<tc>, window_params = [{transform_indices = @transform_0, window_bounds = array<i64: 8, 128>}, {transform_indices = @transform_1, window_bounds = array<i64: 8, 128>}]} {
    %c0 = arith.constant 0 : index
    %c0_0 = arith.constant 0 : index
    %0 = vector.load %arg1[%c0, %c0_0] : memref<8x128xf32, #tpu.memory_space<vmem>>, vector<8x128xf32>
    %cst = arith.constant 1.000000e+00 : f32
    %1 = vector.broadcast %cst : f32 to vector<8x128xf32>
    %cst_1 = arith.constant 0.000000e+00 : f32
    %2 = vector.broadcast %cst_1 : f32 to vector<8x128xf32>
    %cst_2 = arith.constant 0.000000e+00 : f32
    %3 = vector.broadcast %cst_2 : f32 to vector<8x128xf32>
    %4 = arith.cmpf ogt, %0, %3 : vector<8x128xf32>
    %5 = arith.select %4, %1, %2 : vector<8x128xi1>, vector<8x128xf32>
    %6 = arith.cmpf one, %0, %0 : vector<8x128xf32>
    %7 = arith.select %6, %0, %5 : vector<8x128xi1>, vector<8x128xf32>
    %c0_3 = arith.constant 0 : index
    %c0_4 = arith.constant 0 : index
    %8 = vector.load %arg2[%c0_3, %c0_4] : memref<8x128xf32, #tpu.memory_space<vmem>>, vector<8x128xf32>
    tpu.vector_store %arg2[%c0_3, %c0_4], %7 {strides = array<i32>} : memref<8x128xf32, #tpu.memory_space<vmem>>, vector<8x128xf32>,
    return
  }
  func.func @transform_0(%arg0: i32) -> (i32, i32) {
    %c0_i32 = arith.constant 0 : i32
    %c0_i32_0 = arith.constant 0 : i32
    return %arg0, %c0_i32 : i32, i32
  }
  func.func @transform_1(%arg0: i32) -> (i32, i32) {
    %c0_i32 = arith.constant 0 : i32
    %c0_i32_0 = arith.constant 0 : i32
    return %arg0, %c0_i32 : i32, i32
  }
}

</mosaic_0001>

<bundles_post_ra>
// kernel: tpu_custom_call.1
= control target key start
LH: loop header
LB: loop body
LE: loop exit
PB: predicated region body
PF: predicated region fallthrough
CT: control target
= control target key end

     0   :  { %6 = vsyncpa [#allocation3], 0  ;;  %s553_s0 = inlined_call_operand.hbm [shape: f32[16,128], index: 0, kind: input, shape index: {}]   ;;  %s554_s1 = inlined_call_operand.hbm [shape: f32[16,128], index: 1, kind: output, shape index: {}]  }
   0x1   :  { %8 = vsyncpa [#allocation3 + $0x1], 0 }
   0x2   :  { %9 = vsyncpa [#allocation4], 0 }
   0x3   :  { %11 = vsyncpa [#allocation4 + $0x1], 0  ;;  %s392_s6 = smov 0   ;;  %s394_s7 = smov 0  }
   0x4   :  { %s396_s8 = smov 0   ;;  %s398_s9 = smov 0  }
   0x5 LB: > { %s413_s10 = sadd.s32 4294967295, %s377_s9   ;;  %s222_s11 = sadd.s32 4294967294, %s377_s9   ;;  %s377_s9 = sphi %s398_s9, %s569_s9   ;;  %s373_s8 = sphi %s396_s8, %s568_s8   ;;  %s369_s7 = sphi %s394_s7, %s567_s7   ;;  %s365_s6 = sphi %s392_s6, %s566_s6  }
   0x6   : > { %s417_s12 = sadd.s32 1, %s377_s9   ;;  %s24_s13 = sadd.s32 1, %s373_s8 }
   0x7   : > { %s21_s14 = ssub.s32 %s377_s9, %s417_s12  ;;  %p31_p0 = scmp.ne.s32.totalorder %s373_s8, %s369_s7 }
   0x8   : > { %p22_p1 = scmp.eq.s32.totalorder %s21_s14, 0  ;;  %p32_p2 = scmp.eq.s32.totalorder %s377_s9, 0 }
   0x9   : > { %p37_p3 = scmp.ne.s32.totalorder %s369_s7, %s365_s6  ;;  %p38_p4 = scmp.eq.s32.totalorder %s413_s10, 0 }
   0xa   : > { %s429_s15 = scalar_select %p22_p1, %s373_s8, %s24_s13  }
   0xb   : > { %p431_p5 = por %p32_p2, %p31_p0  ;;  %p435_p6 = por %p38_p4, %p37_p3 }
   0xc   : > { %p61_p7 = scmp.eq.s32.totalorder %s413_s10, 1  ;;  %p67_p8 = scmp.eq.s32.totalorder %s222_s11, 1 }
   0xd   : > { %p246_p10 = scmp.lt.s32.totalorder %s377_s9, 2  ;;  %s87_s20 = sand.u32 1, %s373_s8  }
   0xe   : > { %p442_p11 = por %p61_p7, %p31_p0  ;;  %p446_p12 = por %p67_p8, %p37_p3 }
   0xf   : > { %s226_s21 = sshll.u32 %s377_s9, 7  ;;  %s225_s22 = sshll.u32 %s87_s20, 3 }
  0x10   : > { %s558_s18 = scalar_select %p442_p11, 1, 0 }
  0x11   : > { %s559_s19 = scalar_select %p446_p12, 1, 0 }
  0x12   : > { %s455_s25 = scalar_lea.hbm %s553_s0, %s226_s21  ;;  %s91_s26 = scalar_lea.vmem [#allocation2], %s225_s22 }
  0x13   : > { %s98_s27 = sshll.u32 %s91_s26, 4  ;;  %p459_p13 = pnand %p246_p10, %p431_p5  ;;  %s463_s27 = int_to_ptr.vmem [resolvable:$true] %s98_s27 }
  0x14   : > { %s88_s29 = scalar_lea.sflag [#allocation3], %s87_s20  ;;  %s281_s30 = scalar_lea.hbm %s455_s25, 128 }
  0x15   : > { %p282_p2 = scmp.ne.s32.totalorder %s455_s25, %s281_s30  ;;  %p283_p3 = pneg %p459_p13 }
  0x16   : > { %s286_s4 = scalar_lea.hbm %s553_s0, 256  ;;  %p287_p5 = scmp.lt.u32.totalorder %s455_s25, %s553_s0 }
  0x17   : > { %p284_p4 = pnand %p283_p3, %p282_p2  ;;  %p288_p8 = scmp.lt.u32.totalorder %s286_s4, %s281_s30 }
  0x18   : > { %p290_p9 = scmp.lt.u32.totalorder %s281_s30, %s455_s25 }
  0x19   : > { %p285_p7 = pneg %p284_p4  ;;  %p289_p10 = por %p288_p8, %p287_p5 }
  0x1b   : > { %p291_p0 = por %p290_p9, %p289_p10 }
  0x1d   : > { %p292_p1 = pnand %p291_p0, %p285_p7 }
  0x1f   : > { %295 = shalt.err (!%p292_p1)
}
  0x20   : > { %s296_s13 = scalar_lea.vmem %s463_s27, 128  ;;  %s379_s14 = smov [#allocation2]  }
  0x21   : > { %p297_p2 = scmp.ne.s32.totalorder %s463_s27, %s296_s13  ;;  %s301_s16 = sshll.u32 %s379_s14, 4  ;;  %s302_s16 = int_to_ptr.vmem [resolvable:$false] %s301_s16 }
  0x22   : > { %s303_s20 = scalar_lea.vmem %s302_s16, 256  ;;  %p304_p11 = scmp.lt.s32.totalorder %s463_s27, %s302_s16 }
  0x23   : > { %p299_p4 = pnand %p297_p2, %p283_p3  ;;  %p305_p5 = scmp.lt.s32.totalorder %s303_s20, %s296_s13 }
  0x25   : > { %p300_p12 = pneg %p299_p4  ;;  %p306_p8 = por %p305_p5, %p304_p11 }
  0x27   : > { %p307_p9 = pnand %p306_p8, %p300_p12 }
  0x29   : > { %310 = shalt.err (!%p307_p9)
}
  0x2a   : > { %241 = dma.hbm_to_vmem [thread:$0]  (!%p459_p13), %s455_s25, 128, %s463_s27, %s88_s29  }
  0x2b   : > { %p561_p0 = scmp.lt.s32.totalorder %s377_s9, 3  ;;  %p562_p1 = scmp.ge.s32.totalorder %s377_s9, 1 }
  0x2d   : > { %p104_p3 = pnand %p562_p1, %p561_p0 }
  0x2e   : > { %s497_s21 = sand.u32 (!%p104_p3), 1, %s369_s7  }
  0x2f   : > { %107 = sbr.rel (%p104_p3) target bundleno = 81 (0x51), region = 24  ;;  %s228_s22 = sshll.u32 (!%p104_p3), %s497_s21, 3 }
  0x30   : > { %s110_s23 = scalar_lea.sflag (!%p104_p3), [#allocation3], %s497_s21  ;;  %s113_s24 = scalar_lea.vmem (!%p104_p3), [#allocation2], %s228_s22 }
  0x36   : > { %356 = dma.done.wait (%p435_p6), %s110_s23, 128  }
  0x37   : > { %358 = vsyncadd (%p435_p6), %s110_s23, 4294967168  ;;  %s131_s25 = scalar_lea.vmem [#allocation5], %s228_s22  ;;  %s231_s27 = sshll.u32 %s413_s10, 7  ;;  %v132_v0 = vld [vmem:[%s113_s24] sm:$0xff]  ;;  %v380_v1 = vmov 0.0  }
  0x38   : > { %s152_s26 = sshll.u32 %s131_s25, 4  ;;  %vm133_vm0 = vcmp.gt.f32.partialorder %v132_v0, 0.0  ;;  %vm135_vm1 = vcmp.ne.f32.partialorder %v132_v0, %v132_v0  ;;  %s511_s17 = scalar_lea.hbm %s554_s1, %s231_s27  ;;  %s506_s26 = int_to_ptr.vmem [resolvable:$true] %s152_s26 }
  0x39   : > { %v134_v2 = vsel %vm133_vm0, 1.0, %v380_v1  ;;  %s139_s30 = scalar_lea.sflag [#allocation4], %s497_s21  ;;  %s311_s2 = scalar_lea.vmem %s506_s26, 128 }
  0x3a   : > { %v136_v3 = vsel %vm135_vm1, %v132_v0, %v134_v2  ;;  %p312_p6 = scmp.ne.s32.totalorder %s506_s26, %s311_s2  ;;  %p563_p11 = scmp.ne.s32.totalorder %s558_s18, 0 }
  0x3b   : > { %137 = vst [vmem:[%s131_s25] sm:$0xff] %v136_v3  ;;  %s381_s10 = smov [#allocation5]  }
  0x3c   : > { %p313_p12 = pnand %p312_p6, %p563_p11  ;;  %s315_s3 = sshll.u32 %s381_s10, 4  ;;  %s316_s3 = int_to_ptr.vmem [resolvable:$false] %s315_s3 }
  0x3d   : > { %s317_s4 = scalar_lea.vmem %s316_s3, 256  ;;  %p318_p7 = scmp.lt.s32.totalorder %s506_s26, %s316_s3 }
  0x3e   : > { %p314_p13 = pneg %p313_p12  ;;  %p319_p10 = scmp.lt.s32.totalorder %s317_s4, %s311_s2 }
  0x40   : > { %p320_p2 = por %p319_p10, %p318_p7 }
  0x42   : > { %p321_p4 = pnand %p320_p2, %p314_p13 }
  0x44   : > { %324 = shalt.err (!%p321_p4)
}
  0x45   : > { %s325_s5 = scalar_lea.hbm %s511_s17, 128  ;;  %s329_s14 = scalar_lea.hbm %s554_s1, 256 }
  0x46   : > { %p326_p5 = scmp.ne.s32.totalorder %s511_s17, %s325_s5  ;;  %p330_p0 = scmp.lt.u32.totalorder %s511_s17, %s554_s1 }
  0x47   : > { %p331_p1 = scmp.lt.u32.totalorder %s329_s14, %s325_s5  ;;  %p333_p6 = scmp.lt.u32.totalorder %s325_s5, %s511_s17 }
  0x48   : > { %p327_p8 = pnand %p326_p5, %p563_p11 }
  0x49   : > { %p332_p3 = por %p331_p1, %p330_p0 }
  0x4a   : > { %p328_p9 = pneg %p327_p8 }
  0x4b   : > { %p334_p12 = por %p333_p6, %p332_p3 }
  0x4d   : > { %p335_p13 = pnand %p334_p12, %p328_p9 }
  0x4f   : > { %338 = shalt.err (!%p335_p13)
}
  0x50   : > { %236 = dma.vmem_to_hbm [thread:$0]  (%p563_p11), %s506_s26, 128, %s511_s17, %s139_s30  }
  0x51 PF: > { %s164_s21 = sand.u32 1, %s365_s6   ;;  %p564_p7 = scmp.ne.s32.totalorder %s559_s19, 0 }
  0x52   : > { %p565_p10 = scmp.ge.s32.totalorder %s377_s9, 2  ;;  %s165_s22 = scalar_lea.sflag [#allocation4], %s164_s21 }
  0x54   : > { %p243_p2 = pnand %p565_p10, %p564_p7 }
  0x56   : > { %360 = dma.done.wait (!%p243_p2), %s165_s22, 128  }
  0x57   : > { %362 = vsyncadd (!%p243_p2), %s165_s22, 4294967168  ;;  %p14_p4 = scmp.ge.s32.totalorder %s417_s12, 4   ;;  %s566_s6 = smov %s369_s7 }
  0x58   : > { %s567_s7 = smov %s373_s8  ;;  %s568_s8 = smov %s429_s15 }
  0x59   : > { %s569_s9 = smov %s417_s12  ;;  %16 = sbr.rel (!%p14_p4) target bundleno = 5 (0x5), region = 69 }
  0x60   :  { %170 = vsyncpa [#allocation3], 1 }
  0x61   :  { %172 = vsyncpa [#allocation3 + $0x1], 1 }
  0x62   :  { %173 = vsyncpa [#allocation4], 1 }
  0x63   :  { %175 = vsyncpa [#allocation4 + $0x1], 1 }

</bundles_post_ra>
